<compile_context>
chip_gen: v7x
topology: tpu7x:2x2x1
jax: 0.10.0
libtpu: 0.0.40
codegen_flags: <defaults>
</compile_context>

<pallas_src>
import math

import jax
import jax.numpy as jnp
from jax.experimental import pallas as pl
from jax.experimental.pallas import tpu as pltpu


# ----------------------------------------------------------------------------- #
# Pallas kernel: FM (1st + 2nd order) + wide linear + 2-layer DNN + final linear
# + sigmoid(0.5 * (wide + deep + fm)), fully fused, feature-major layout.
# ----------------------------------------------------------------------------- #
def _fused_kernel(xt_ref, dnnt_ref, vfm_ref, vsq_ref, w1_ref, b1_ref,
                  w2_ref, b2_ref, wf_ref, o_ref):
    f32 = jnp.float32

    # ---- FM part (feature-major): two small MXU matmuls, no concat / zero padding ----
    xt = xt_ref[...]                                         # (n_fm, TB) bf16
    xt32 = xt.astype(f32)
    xsq = (xt32 * xt32).astype(xt.dtype)                     # x*x, back to bf16 for MXU

    vfm = vfm_ref[...]                                       # (k+1, n_fm) = [v ; w_fm]
    k = vfm.shape[0] - 1
    fm1 = jnp.dot(vfm, xt, preferred_element_type=f32)       # (k+1, TB)
    xv = fm1[:k, :]                                          # v @ x^T   (sublane-aligned split)
    x1 = fm1[k:, :]                                          # linear_fm (b_fm folded into wide bias)
    sos = jnp.dot(vsq_ref[...], xsq, preferred_element_type=f32)   # (v*v) @ (x*x)^T  (k, TB)
    x2 = 0.5 * jnp.sum(xv * xv - sos, axis=0, keepdims=True)       # (1, TB)

    # ---- Deep + wide: wide linear is the extra row of W1; biases are separate f32 columns ----
    w1 = w1_ref[...]                                         # (H1+1, dnn_in) bf16
    h1n = w1.shape[0] - 1
    h_aug = jnp.dot(w1, dnnt_ref[...], preferred_element_type=f32) + b1_ref[...]   # (H1+1, TB)
    wide = h_aug[h1n:, :]                                    # wide linear + b_w + b_fm + b_f
    h = jnp.maximum(h_aug[:h1n, :], 0.0)                     # ReLU (dropout p=0)

    w2 = w2_ref[...]                                         # (H2, H1) bf16
    h2 = jnp.dot(w2, h.astype(w2.dtype), preferred_element_type=f32) + b2_ref[...]
    h2 = jnp.maximum(h2, 0.0)
    # final out_features=1 linear as VPU multiply + sublane reduce (no N=1 matmul)
    deep = jnp.sum(h2 * wf_ref[...], axis=0, keepdims=True)  # (1, TB)

    z = 0.5 * (wide + deep + x1 + x2)
    o_ref[...] = 1.0 / (1.0 + jnp.exp(-z))                   # exact sigmoid, f32


def _pick_batch_tile(bp, max_tile=4096):
    """Largest 128-multiple divisor of bp, <= max_tile, keeping >=2 grid steps if possible."""
    n128 = bp // 128
    if n128 <= 1:
        return bp
    cap = max(1, min(max_tile // 128, n128 // 2))
    d = 1
    for cand in range(1, cap + 1):
        if n128 % cand == 0:
            d = cand
    return 128 * d


def fused_wide_deep_fm(conv_t, dnn_t, packed):
    """Batch-tiled Pallas call; activations feature-major (features, batch)."""
    B = conv_t.shape[1]
    bp = 128 * ((B + 127) // 128)              # pad lanes to 128 only (waste <= 127 cols)
    tb = _pick_batch_tile(bp)                  # multiple of 128, divisor of bp, <= 4096
    nt = bp // tb                              # >= 2 whenever bp >= 256 (v7x megacore)
    pad = bp - B

    # bf16 activations (HBM-bound operand); pad+cast fuse with the upstream concat.
    xt = jnp.pad(conv_t, ((0, 0), (0, pad))).astype(jnp.bfloat16)
    dt = jnp.pad(dnn_t, ((0, 0), (0, pad))).astype(jnp.bfloat16)

    vfm, vsq, w1m, b1c, w2m, b2c, wfc = packed
    weights = (vfm, vsq, w1m, b1c, w2m, b2c, wfc)

    flops = 2 * bp * (vfm.shape[0] * vfm.shape[1] + vsq.shape[0] * vsq.shape[1]
                      + w1m.shape[0] * w1m.shape[1] + w2m.shape[0] * w2m.shape[1])
    bytes_accessed = (xt.size * 2 + dt.size * 2 + bp * 4
                      + sum(int(a.size) * a.dtype.itemsize for a in weights))

    const = lambda i: (0, 0)                   # resident weights: DMA'd once, stay in VMEM
    out = pl.pallas_call(
        _fused_kernel,
        out_shape=jax.ShapeDtypeStruct((1, bp), jnp.float32),
        grid=(nt,),
        in_specs=[
            pl.BlockSpec((xt.shape[0], tb), lambda i: (0, i)),       # FM activations
            pl.BlockSpec((dt.shape[0], tb), lambda i: (0, i)),       # DNN activations
            pl.BlockSpec(vfm.shape, const),
            pl.BlockSpec(vsq.shape, const),
            pl.BlockSpec(w1m.shape, const),
            pl.BlockSpec(b1c.shape, const),
            pl.BlockSpec(w2m.shape, const),
            pl.BlockSpec(b2c.shape, const),
            pl.BlockSpec(wfc.shape, const),
        ],
        out_specs=pl.BlockSpec((1, tb), lambda i: (0, i)),           # lane-dense (1, TB) store
        compiler_params=pltpu.CompilerParams(dimension_semantics=("parallel",)),
        cost_estimate=pl.CostEstimate(flops=int(flops),
                                      transcendentals=int(bp),
                                      bytes_accessed=int(bytes_accessed)),
    )(xt, dt, *weights)

    return out[:, :B].T                                              # (B, 1)


# ----------------------------------------------------------------------------- #
# Host-side weight packing (one-time; XLA ops on tiny tensors).
# ----------------------------------------------------------------------------- #
def pack_params(params, cfg):
    n_dense_full, dnn_in = cfg["n_dense_full"], cfg["dnn_in"]
    h1, h2 = cfg["dnn_hidden"]
    bf16 = jnp.bfloat16

    # FM: [v ; w_fm] for the first matmul, v*v for the second.
    vfm_slab = jnp.concatenate([params["v"], params["w_fm"]], axis=0).astype(bf16)   # (k+1, n_fm)
    vsq_slab = (params["v"] * params["v"]).astype(bf16)                              # (k, n_fm)

    # wide linear acts on dense_input == trailing n_dense_full rows of the dnn input
    wide_row = jnp.concatenate(
        [jnp.zeros((1, dnn_in - n_dense_full), jnp.float32), params["w_wide"]], axis=1)
    w1_mat = jnp.concatenate([params["W1"], wide_row], axis=0).astype(bf16)          # (h1+1, dnn_in)
    bias_tail = params["b_wide"] + params["b_fm"] + params["bf"]                     # all scalar biases
    b1_col = jnp.concatenate(
        [params["b1"].reshape(h1, 1), bias_tail.reshape(1, 1)], axis=0)              # (h1+1, 1) f32

    w2_mat = params["W2"].astype(bf16)                                               # (h2, h1)
    b2_col = params["b2"].reshape(h2, 1)                                             # (h2, 1) f32
    wf_col = params["Wf"].reshape(h2, 1)                                             # (h2, 1) f32
    return vfm_slab, vsq_slab, w1_mat, b1_col, w2_mat, b2_col, wf_col


# ----------------------------------------------------------------------------- #
# Plain-JAX glue: embedding gathers + graph-feature construction (feature-major).
# ----------------------------------------------------------------------------- #
def graph_widedeep_forward(X, params, cfg):
    n_sparse = cfg["n_sparse"]
    keep = cfg["keep"]                       # == new_features_length
    n_fm = cfg["n_fm"]
    emb = cfg["emb_size"]
    B = X.shape[0]

    # X = X[:, :-new_feature_length]
    Xs = X[:, :-keep]
    ids_t = Xs[:, :n_sparse].astype(jnp.int32).T                    # (n_sparse, B)
    dense_raw_t = Xs[:, n_sparse:].T                                # (n_dense_raw, B)

    # embedding_dict2 (dim 1): feature-major gather -> (n_sparse, B)
    emb2 = params["emb2"]                                           # (n_sparse, vocab)
    sparse_emb_t = emb2[jnp.arange(n_sparse)[:, None], ids_t]       # (n_sparse, B)
    conv_t = jnp.concatenate([sparse_emb_t, dense_raw_t], axis=0)   # (n_fm, B) feature-major

    # ---------------- graph feature construction ----------------
    # TODO(synk): GATConv / SAGPooling / coo_matrix come from torch_geometric; implemented
    # here as a dense-adjacency GAT + GraphConv-scored per-graph top-k pooling in plain JAX
    # (data-dependent per-graph top-k / gather has no clean Pallas equivalent at these sizes).
    conv_features = conv_t.T                                        # (B, n_fm) for graph glue
    v = params["v"]
    v1 = v / jnp.maximum(jnp.linalg.norm(v, axis=0, keepdims=True), 1e-12)
    vtv = jnp.abs(v1.T @ v1)
    adj = (vtv > 0.2) | jnp.eye(n_fm, dtype=bool)                   # [src, dst], self loops

    # GATConv(1, 1): scalar weight + scalar attention params
    h = conv_features * params["gat_w"]                             # (B, n)
    e = params["gat_a_src"] * h[:, :, None] + params["gat_a_dst"] * h[:, None, :]
    e = jnp.where(e > 0, e, 0.2 * e)                                # LeakyReLU(0.2)
    e = jnp.where(adj[None, :, :], e, -jnp.inf)
    alpha = jax.nn.softmax(e, axis=1)                               # over sources j
    gat_out = jnp.einsum("bji,bj->bi", alpha, h) + params["gat_b"]  # (B, n)

    # SAGPooling(1, ratio): GraphConv score -> top-k -> x * tanh(score)
    nbr = jnp.einsum("ji,bj->bi", adj.astype(jnp.float32), gat_out)
    score = params["pool_w_root"] * gat_out + params["pool_w_nbr"] * nbr + params["pool_b"]
    idx = jnp.argsort(-score, axis=1)[:, :keep]                     # descending per graph
    x_keep = jnp.take_along_axis(gat_out, idx, axis=1)
    s_keep = jnp.take_along_axis(score, idx, axis=1)
    new_features_t = (x_keep * jnp.tanh(s_keep)).T                  # (keep, B) feature-major
    new_features_t = new_features_t / jnp.maximum(
        jnp.linalg.norm(new_features_t, axis=1, keepdims=True), 1e-12)   # normalize(dim=0)

    # ---------------- wide & deep inputs (built feature-major, no transpose pass) -----
    emb1_t = jnp.transpose(params["emb1"], (0, 2, 1))               # (n_sparse, emb, vocab)
    sparse_embeds_t = emb1_t[jnp.arange(n_sparse)[:, None, None],
                             jnp.arange(emb)[None, :, None],
                             ids_t[:, None, :]]                     # (n_sparse, emb, B)
    sparse_embeds_t = sparse_embeds_t.reshape(n_sparse * emb, B)    # (n_sparse*emb, B)
    dnn_t = jnp.concatenate(
        [sparse_embeds_t, dense_raw_t, new_features_t], axis=0)     # (dnn_in, B)

    # ---------------- fused Pallas kernel ----------------
    packed = pack_params(params, cfg)
    return fused_wide_deep_fm(conv_t, dnn_t, packed)


# ----------------------------------------------------------------------------- #
# Deterministic parameter initialization (shapes implied by Graph_WideDeep.__init__)
# ----------------------------------------------------------------------------- #
def init_params(key, cfg):
    n_sparse, vocab, emb = cfg["n_sparse"], cfg["vocab"], cfg["emb_size"]
    n_fm, k_fm = cfg["n_fm"], cfg["k_fm"]
    n_dense_full, dnn_in = cfg["n_dense_full"], cfg["dnn_in"]
    h1, h2 = cfg["dnn_hidden"]
    ks = jax.random.split(key, 24)

    def lin(k, out_f, in_f):
        scale = 1.0 / math.sqrt(in_f)
        return jax.random.uniform(k, (out_f, in_f), jnp.float32, -scale, scale)

    bound_v = math.sqrt(6.0 / (k_fm + n_fm))   # xavier_uniform_
    params = {
        "emb1": 1e-4 * jax.random.normal(ks[0], (n_sparse, vocab, emb), jnp.float32),
        "emb2": 1e-4 * jax.random.normal(ks[1], (n_sparse, vocab), jnp.float32),
        "w_fm": lin(ks[2], 1, n_fm),
        "b_fm": jnp.zeros((1, 1), jnp.float32),
        "v": jax.random.uniform(ks[3], (k_fm, n_fm), jnp.float32, -bound_v, bound_v),
        # GATConv(1,1) scalars
        "gat_w": jax.random.normal(ks[4], ()) * 0.5,
        "gat_a_src": jax.random.normal(ks[5], ()) * 0.5,
        "gat_a_dst": jax.random.normal(ks[6], ()) * 0.5,
        "gat_b": jnp.float32(0.0),
        # SAGPooling GraphConv(1,1) scalars
        "pool_w_root": jax.random.normal(ks[7], ()) * 0.5,
        "pool_w_nbr": jax.random.normal(ks[8], ()) * 0.5,
        "pool_b": jnp.float32(0.0),
        # wide linear
        "w_wide": lin(ks[9], 1, n_dense_full),
        "b_wide": jnp.zeros((1, 1), jnp.float32),
        # deep DNN + final linear
        "W1": lin(ks[10], h1, dnn_in), "b1": jnp.zeros((1, h1), jnp.float32),
        "W2": lin(ks[11], h2, h1),     "b2": jnp.zeros((1, h2), jnp.float32),
        "Wf": lin(ks[12], 1, h2),      "bf": jnp.zeros((1, 1), jnp.float32),
    }
    return params


if __name__ == "__main__":
    key = jax.random.PRNGKey(0)

    # small, self-consistent configuration
    B = 2
    n_sparse = 4
    n_dense_raw = 4
    vocab = 10
    emb_size = 8
    ratio = 0.25
    n_fm = n_sparse + n_dense_raw                    # feat_sizes_raw
    keep = int(math.ceil(ratio * n_fm))              # new_features_length = 2
    n_dense_full = n_dense_raw + keep                # len(dense_feature_columns)
    dnn_hidden = (32, 16)
    dnn_in = emb_size * n_sparse + n_dense_full      # 38

    cfg = dict(n_sparse=n_sparse, n_dense_raw=n_dense_raw, vocab=vocab,
               emb_size=emb_size, n_fm=n_fm, k_fm=emb_size, keep=keep,
               n_dense_full=n_dense_full, dnn_in=dnn_in, dnn_hidden=dnn_hidden)

    k_p, k_id, k_d, k_tail = jax.random.split(key, 4)
    params = init_params(k_p, cfg)

    # Input layout: [sparse ids (4) | raw dense (4) | placeholder new-features (2)]
    sparse_ids = jax.random.randint(k_id, (B, n_sparse), 0, vocab).astype(jnp.float32)
    dense_vals = jax.random.normal(k_d, (B, n_dense_raw), jnp.float32)
    tail_vals = jax.random.normal(k_tail, (B, keep), jnp.float32)
    X = jnp.concatenate([sparse_ids, dense_vals, tail_vals], axis=1)   # (2, 10)

    out = graph_widedeep_forward(X, params, cfg)
    out = jax.block_until_ready(out)
    assert out.shape == (B, 1)
    assert bool(jnp.all(jnp.isfinite(out)))
    print("KERNEL_OK")
</pallas_src>

<mosaic_0001>
module attributes {stable_mosaic.version = 11 : i64} {
  func.func @_fused_kernel(%arg0: i32, %arg1: memref<8x128xbf16, #tpu.memory_space<vmem>>, %arg2: memref<38x128xbf16, #tpu.memory_space<vmem>>, %arg3: memref<9x8xbf16, #tpu.memory_space<vmem>>, %arg4: memref<8x8xbf16, #tpu.memory_space<vmem>>, %arg5: memref<33x38xbf16, #tpu.memory_space<vmem>>, %arg6: memref<33x1xf32, #tpu.memory_space<vmem>>, %arg7: memref<16x32xbf16, #tpu.memory_space<vmem>>, %arg8: memref<16x1xf32, #tpu.memory_space<vmem>>, %arg9: memref<16x1xf32, #tpu.memory_space<vmem>>, %arg10: memref<1x128xf32, #tpu.memory_space<vmem>>) attributes {dimension_semantics = [#tpu.dimension_semantics<parallel>], iteration_bounds = array<i64: 1>, scalar_prefetch = 0 : i64, scratch_operands = 0 : i64, tpu.core_type = #tpu.core_type<tc>, window_params = [{transform_indices = @transform_0, window_bounds = array<i64: 8, 128>}, {transform_indices = @transform_1, window_bounds = array<i64: 38, 128>}, {pipeline_mode = #tpu.pipeline_mode<synchronous>, transform_indices = @transform_2, window_bounds = array<i64: 9, 8>}, {pipeline_mode = #tpu.pipeline_mode<synchronous>, transform_indices = @transform_3, window_bounds = array<i64: 8, 8>}, {pipeline_mode = #tpu.pipeline_mode<synchronous>, transform_indices = @transform_4, window_bounds = array<i64: 33, 38>}, {pipeline_mode = #tpu.pipeline_mode<synchronous>, transform_indices = @transform_5, window_bounds = array<i64: 33, 1>}, {pipeline_mode = #tpu.pipeline_mode<synchronous>, transform_indices = @transform_6, window_bounds = array<i64: 16, 32>}, {pipeline_mode = #tpu.pipeline_mode<synchronous>, transform_indices = @transform_7, window_bounds = array<i64: 16, 1>}, {pipeline_mode = #tpu.pipeline_mode<synchronous>, transform_indices = @transform_8, window_bounds = array<i64: 16, 1>}, {transform_indices = @transform_9, window_bounds = array<i64: 1, 128>}]} {
    %c0 = arith.constant 0 : index
    %c0_0 = arith.constant 0 : index
    %0 = vector.load %arg1[%c0, %c0_0] : memref<8x128xbf16, #tpu.memory_space<vmem>>, vector<8x128xbf16>
    %1 = arith.extf %0 : vector<8x128xbf16> to vector<8x128xf32>
    %2 = arith.mulf %1, %1 : vector<8x128xf32>
    %3 = arith.truncf %2 : vector<8x128xf32> to vector<8x128xbf16>
    %c0_1 = arith.constant 0 : index
    %c0_2 = arith.constant 0 : index
    %4 = vector.load %arg3[%c0_1, %c0_2] : memref<9x8xbf16, #tpu.memory_space<vmem>>, vector<9x8xbf16>
    %cst = arith.constant dense<0.000000e+00> : vector<9x128xf32>
    %5 = tpu.matmul %4, %0, %cst {dimension_numbers = #tpu.dot_dimension_numbers<[1], [0], [0], [1], [0, 0, 1, 1], [], []>} : vector<9x8xbf16>, vector<8x128xbf16>, vector<9x128xf32> -> vector<9x128xf32>
    %6 = vector.extract_strided_slice %5 {offsets = [0, 0], sizes = [8, 128], strides = [1, 1]} : vector<9x128xf32> to vector<8x128xf32>
    %7 = vector.extract_strided_slice %5 {offsets = [8, 0], sizes = [1, 128], strides = [1, 1]} : vector<9x128xf32> to vector<1x128xf32>
    %c0_3 = arith.constant 0 : index
    %c0_4 = arith.constant 0 : index
    %8 = vector.load %arg4[%c0_3, %c0_4] : memref<8x8xbf16, #tpu.memory_space<vmem>>, vector<8x8xbf16>
    %cst_5 = arith.constant dense<0.000000e+00> : vector<8x128xf32>
    %9 = tpu.matmul %8, %3, %cst_5 {dimension_numbers = #tpu.dot_dimension_numbers<[1], [0], [0], [1], [0, 0, 1, 1], [], []>} : vector<8x8xbf16>, vector<8x128xbf16>, vector<8x128xf32> -> vector<8x128xf32>
    %10 = arith.mulf %6, %6 : vector<8x128xf32>
    %11 = arith.subf %10, %9 : vector<8x128xf32>
    %cst_6 = arith.constant dense<0.000000e+00> : vector<128xf32>
    %12 = vector.multi_reduction <add>, %11, %cst_6 [0] : vector<8x128xf32> to vector<128xf32>
    %13 = vector.shape_cast %12 : vector<128xf32> to vector<1x128xf32>
    %cst_7 = arith.constant 5.000000e-01 : f32
    %14 = vector.broadcast %cst_7 : f32 to vector<1x128xf32>
    %15 = arith.mulf %14, %13 : vector<1x128xf32>
    %c0_8 = arith.constant 0 : index
    %c0_9 = arith.constant 0 : index
    %16 = vector.load %arg5[%c0_8, %c0_9] : memref<33x38xbf16, #tpu.memory_space<vmem>>, vector<33x38xbf16>
    %c0_10 = arith.constant 0 : index
    %c0_11 = arith.constant 0 : index
    %17 = vector.load %arg2[%c0_10, %c0_11] : memref<38x128xbf16, #tpu.memory_space<vmem>>, vector<38x128xbf16>
    %cst_12 = arith.constant dense<0.000000e+00> : vector<33x128xf32>
    %18 = tpu.matmul %16, %17, %cst_12 {dimension_numbers = #tpu.dot_dimension_numbers<[1], [0], [0], [1], [0, 0, 1, 1], [], []>} : vector<33x38xbf16>, vector<38x128xbf16>, vector<33x128xf32> -> vector<33x128xf32>
    %c0_13 = arith.constant 0 : index
    %c0_14 = arith.constant 0 : index
    %19 = vector.load %arg6[%c0_13, %c0_14] : memref<33x1xf32, #tpu.memory_space<vmem>>, vector<33x1xf32>
    %20 = vector.broadcast %19 : vector<33x1xf32> to vector<33x128xf32>
    %21 = arith.addf %18, %20 : vector<33x128xf32>
    %22 = vector.extract_strided_slice %21 {offsets = [32, 0], sizes = [1, 128], strides = [1, 1]} : vector<33x128xf32> to vector<1x128xf32>
    %23 = vector.extract_strided_slice %21 {offsets = [0, 0], sizes = [32, 128], strides = [1, 1]} : vector<33x128xf32> to vector<32x128xf32>
    %cst_15 = arith.constant 0.000000e+00 : f32
    %24 = vector.broadcast %cst_15 : f32 to vector<32x128xf32>
    %25 = arith.maximumf %23, %24 : vector<32x128xf32>
    %c0_16 = arith.constant 0 : index
    %c0_17 = arith.constant 0 : index
    %26 = vector.load %arg7[%c0_16, %c0_17] : memref<16x32xbf16, #tpu.memory_space<vmem>>, vector<16x32xbf16>
    %27 = arith.truncf %25 : vector<32x128xf32> to vector<32x128xbf16>
    %cst_18 = arith.constant dense<0.000000e+00> : vector<16x128xf32>
    %28 = tpu.matmul %26, %27, %cst_18 {dimension_numbers = #tpu.dot_dimension_numbers<[1], [0], [0], [1], [0, 0, 1, 1], [], []>} : vector<16x32xbf16>, vector<32x128xbf16>, vector<16x128xf32> -> vector<16x128xf32>
    %c0_19 = arith.constant 0 : index
    %c0_20 = arith.constant 0 : index
    %29 = vector.load %arg8[%c0_19, %c0_20] : memref<16x1xf32, #tpu.memory_space<vmem>>, vector<16x1xf32>
    %30 = vector.broadcast %29 : vector<16x1xf32> to vector<16x128xf32>
    %31 = arith.addf %28, %30 : vector<16x128xf32>
    %cst_21 = arith.constant 0.000000e+00 : f32
    %32 = vector.broadcast %cst_21 : f32 to vector<16x128xf32>
    %33 = arith.maximumf %31, %32 : vector<16x128xf32>
    %c0_22 = arith.constant 0 : index
    %c0_23 = arith.constant 0 : index
    %34 = vector.load %arg9[%c0_22, %c0_23] : memref<16x1xf32, #tpu.memory_space<vmem>>, vector<16x1xf32>
    %35 = vector.broadcast %34 : vector<16x1xf32> to vector<16x128xf32>
    %36 = arith.mulf %33, %35 : vector<16x128xf32>
    %cst_24 = arith.constant dense<0.000000e+00> : vector<128xf32>
    %37 = vector.multi_reduction <add>, %36, %cst_24 [0] : vector<16x128xf32> to vector<128xf32>
    %38 = vector.shape_cast %37 : vector<128xf32> to vector<1x128xf32>
    %39 = arith.addf %22, %38 : vector<1x128xf32>
    %40 = arith.addf %39, %7 : vector<1x128xf32>
    %41 = arith.addf %40, %15 : vector<1x128xf32>
    %cst_25 = arith.constant 5.000000e-01 : f32
    %42 = vector.broadcast %cst_25 : f32 to vector<1x128xf32>
    %43 = arith.mulf %42, %41 : vector<1x128xf32>
    %cst_26 = arith.constant 0.000000e+00 : f32
    %44 = vector.broadcast %cst_26 : f32 to vector<1x128xf32>
    %45 = arith.subf %44, %43 : vector<1x128xf32>
    %46 = math.exp %45 : vector<1x128xf32>
    %cst_27 = arith.constant 1.000000e+00 : f32
    %47 = vector.broadcast %cst_27 : f32 to vector<1x128xf32>
    %48 = arith.addf %47, %46 : vector<1x128xf32>
    %cst_28 = arith.constant 1.000000e+00 : f32
    %49 = vector.broadcast %cst_28 : f32 to vector<1x128xf32>
    %50 = arith.divf %49, %48 : vector<1x128xf32>
    %c0_29 = arith.constant 0 : index
    %c0_30 = arith.constant 0 : index
    %51 = vector.load %arg10[%c0_29, %c0_30] : memref<1x128xf32, #tpu.memory_space<vmem>>, vector<1x128xf32>
    tpu.vector_store %arg10[%c0_29, %c0_30], %50 {strides = array<i32>} : memref<1x128xf32, #tpu.memory_space<vmem>>, vector<1x128xf32>,
    return
  }
  func.func @transform_0(%arg0: i32) -> (i32, i32) {
    %c0_i32 = arith.constant 0 : i32
    %c0_i32_0 = arith.constant 0 : i32
    return %c0_i32, %arg0 : i32, i32
  }
  func.func @transform_1(%arg0: i32) -> (i32, i32) {
    %c0_i32 = arith.constant 0 : i32
    %c0_i32_0 = arith.constant 0 : i32
    return %c0_i32, %arg0 : i32, i32
  }
  func.func @transform_2(%arg0: i32) -> (i32, i32) {
    %c0_i32 = arith.constant 0 : i32
    %c0_i32_0 = arith.constant 0 : i32
    %c0_i32_1 = arith.constant 0 : i32
    return %c0_i32, %c0_i32_0 : i32, i32
  }
  func.func @transform_3(%arg0: i32) -> (i32, i32) {
    %c0_i32 = arith.constant 0 : i32
    %c0_i32_0 = arith.constant 0 : i32
    %c0_i32_1 = arith.constant 0 : i32
    return %c0_i32, %c0_i32_0 : i32, i32
  }
  func.func @transform_4(%arg0: i32) -> (i32, i32) {
    %c0_i32 = arith.constant 0 : i32
    %c0_i32_0 = arith.constant 0 : i32
    %c0_i32_1 = arith.constant 0 : i32
    return %c0_i32, %c0_i32_0 : i32, i32
  }
  func.func @transform_5(%arg0: i32) -> (i32, i32) {
    %c0_i32 = arith.constant 0 : i32
    %c0_i32_0 = arith.constant 0 : i32
    %c0_i32_1 = arith.constant 0 : i32
    return %c0_i32, %c0_i32_0 : i32, i32
  }
  func.func @transform_6(%arg0: i32) -> (i32, i32) {
    %c0_i32 = arith.constant 0 : i32
    %c0_i32_0 = arith.constant 0 : i32
    %c0_i32_1 = arith.constant 0 : i32
    return %c0_i32, %c0_i32_0 : i32, i32
  }
  func.func @transform_7(%arg0: i32) -> (i32, i32) {
    %c0_i32 = arith.constant 0 : i32
    %c0_i32_0 = arith.constant 0 : i32
    %c0_i32_1 = arith.constant 0 : i32
    return %c0_i32, %c0_i32_0 : i32, i32
  }
  func.func @transform_8(%arg0: i32) -> (i32, i32) {
    %c0_i32 = arith.constant 0 : i32
    %c0_i32_0 = arith.constant 0 : i32
    %c0_i32_1 = arith.constant 0 : i32
    return %c0_i32, %c0_i32_0 : i32, i32
  }
  func.func @transform_9(%arg0: i32) -> (i32, i32) {
    %c0_i32 = arith.constant 0 : i32
    %c0_i32_0 = arith.constant 0 : i32
    return %c0_i32, %arg0 : i32, i32
  }
}

</mosaic_0001>

<bundles_post_ra>
// kernel: tpu_custom_call.1
= control target key start
LH: loop header
LB: loop body
LE: loop exit
PB: predicated region body
PF: predicated region fallthrough
CT: control target
= control target key end

     0   :  { %vm49_vm0 = vcmask 1043456   ;;  %vm45_vm1 = vcmask 64512   ;;  %v519_v1 = vmov 0.0   ;;  %vm520_vm2 = vmmov 0   ;;  %s674_s0 = inlined_call_operand.vmem [shape: bf16[8,128], index: 0, kind: input, shape index: {}]   ;;  %s675_s1 = inlined_call_operand.vmem [shape: bf16[38,128], index: 1, kind: input, shape index: {}]   ;;  %s676_s2 = inlined_call_operand.vmem [shape: bf16[9,8], index: 2, kind: input, shape index: {}]   ;;  %s677_s3 = inlined_call_operand.vmem [shape: bf16[8,8], index: 3, kind: input, shape index: {}]   ;;  %s678_s4 = inlined_call_operand.vmem [shape: bf16[33,38], index: 4, kind: input, shape index: {}]   ;;  %s679_s5 = inlined_call_operand.vmem [shape: f32[33,1], index: 5, kind: input, shape index: {}]   ;;  %s680_s6 = inlined_call_operand.vmem [shape: bf16[16,32], index: 6, kind: input, shape index: {}]   ;;  %s681_s7 = inlined_call_operand.vmem [shape: f32[16,1], index: 7, kind: input, shape index: {}]   ;;  %s682_s8 = inlined_call_operand.vmem [shape: f32[16,1], index: 8, kind: input, shape index: {}]   ;;  %s683_s9 = inlined_call_operand.hbm [shape: f32[1,128], index: 9, kind: output, shape index: {}]  }
   0x1   :  { %v34_v0 = vld [vmem:[%s674_s0] sm:$0xf]  ;;  %433 = vmatprep.subr.bf16.mxu0 %v519_v1  ;;  %435 = vmatprep.mubr.msk.bf16.mxu0 %vm520_vm2, %v519_v1  ;;  %v485_v8 = vld [vmem:[%s675_s1 + $0x8] sm:$0xff]   ;;  %v486_v9 = vld [vmem:[%s675_s1 + $0x10] ss:$0 sps:$4 sm:$0x77]  }
   0x2   :  { %v35_v2 = vunpack.c.l.bf16 %v34_v0  ;;  %v51_v3 = vsel %vm49_vm0, %v34_v0, 0  ;;  %v484_v4 = vld [vmem:[%s675_s1] sm:$0xff]   ;;  %439 = vmatprep.subr.bf16.mxu1 %v519_v1  ;;  %441 = vmatprep.mubr.msk.bf16.mxu1 %vm520_vm2, %v519_v1  ;;  %vm228_vm3 = vcmask 1042432   ;;  %v521_v13 = vmov 0   ;;  %v161_v15 = vld [vmem:[%s679_s5 + $0x8] sm:$0xff]  ;;  %v162_v16 = vld [vmem:[%s679_s5 + $0x10] sm:$0xff] }
   0x3   :  { %434 = vmatpush3.bf16.msra.mxu0 %v51_v3  ;;  %v483_v5 = vld [vmem:[%s676_s2] sm:$0x1f]   ;;  %481 = vset.pattern.permute.xlu0 %v521_v13  ;;  %v230_v14 = vsel %vm228_vm3, %v486_v9, 0 }
   0x4   :  { %445 = vmatprep.subr.bf16.mxu0 %v519_v1  ;;  %v36_v6 = vmul.f32 %v35_v2, %v35_v2  ;;  %v94_v11 = vld [vmem:[%s677_s3] sm:$0xf] }
   0x5   :  { %v160_v12 = vld [vmem:[%s679_s5] sm:$0xff] }
   0x6   :  { %436 = vmatmul.mubr.msk.bf16.vlgmr.msra.gmra.mrb[0].mxu0 %vm45_vm1, %v483_v5  ;;  %v37_v7 = vpack.c.bf16 %v36_v6, %v36_v6  ;;  %167 = vperm.xlu0 %481, %v160_v12  }
   0x7   :  { %446 = vmatpush3.bf16.msra.mxu0 %v484_v4  ;;  %451 = vmatprep.mubr.msk.bf16.mxu0 %vm520_vm2, %v519_v1 }
   0x8   :  { %v99_v10 = vsel %vm49_vm0, %v37_v7, 0  ;;  %447 = vmatprep.subr.bf16.mxu0 %v519_v1 }
   0x9   :  { %440 = vmatpush3.bf16.msra.mxu1 %v99_v10 }
   0xa   :  { %471 = vmatprep.subr.bf16.mxu1 %v519_v1 }
   0xb   :  { %448 = vmatpush3.bf16.msra.mxu0 %v485_v8 }
   0xc   :  { %442 = vmatmul.mubr.msk.bf16.vlgmr.msra.gmra.mrb[0].mxu1 %vm45_vm1, %v94_v11  ;;  %449 = vmatprep.subr.bf16.mxu0 %v519_v1 }
   0xd   :  { %474 = vmatpush3.bf16.msra.mxu1 %v484_v4  ;;  %459 = vmatprep.mubr.msk.bf16.mxu1 %vm520_vm2, %v519_v1 }
   0xe   :  { %14 = vsyncpa [#allocation3], 0  ;;  %472 = vmatprep.subr.bf16.mxu1 %v519_v1  ;;  %v487_v17 = vld [vmem:[%s678_s4] sm:$0xff]   ;;  %482 = vset.pattern.permute.xlu1 %v521_v13  ;;  %vm218_vm4 = vcmask 310272   ;;  %v163_v19 = vld [vmem:[%s679_s5 + $0x18] sm:$0xff]  ;;  %vm313_vm5 = vcmask 261120  }
   0xf   :  { %450 = vmatpush3.bf16.msra.mxu0 %v230_v14  ;;  %172 = vperm.xlu0 %481, %v161_v15   ;;  %v296_v18 = vld [vmem:[%s681_s7] sm:$0xff]  ;;  %v488_v20 = vld [vmem:[%s678_s4 + $0x10] ss:$0 sps:$4 sm:$0x11]   ;;  %v297_v22 = vld [vmem:[%s681_s7 + $0x8] sm:$0xff] }
  0x10   :  { %177 = vperm.xlu1 %482, %v162_v16   ;;  %v360_v21 = vld [vmem:[%s682_s8] sm:$0xff]  ;;  %v489_v23 = vld [vmem:[%s678_s4 + $0x8] sm:$0xff]  }
  0x11   :  { %475 = vmatpush3.bf16.msra.mxu1 %v485_v8  ;;  %v164_v24 = vld [vmem:[%s679_s5 + $0x20] sm:$0x1]  ;;  %v361_v25 = vld [vmem:[%s682_s8 + $0x8] sm:$0xff] }
  0x12   :  { %452 = vmatmul.mubr.msk.bf16.vlgmr.msra.gmra.mrb[4].mxu0 %vm218_vm4, %v487_v17  ;;  %473 = vmatprep.subr.bf16.mxu1 %v519_v1  ;;  %v490_v62 = vld [vmem:[%s680_s6] sm:$0xff]   ;;  %s522_s6 = smov [#allocation2]  }
  0x13   :  { %455 = vmatprep.mubr.msk.bf16.mxu0 %vm520_vm2, %v519_v1  ;;  %300 = vperm.xlu0 %481, %v296_v18   ;;  %s398_s7 = sshll.u32 %s522_s6, 4  ;;  %s399_s7 = int_to_ptr.vmem [resolvable:$true] %s398_s7 }
  0x14   :  { %182 = vperm.xlu1 %482, %v163_v19   ;;  %s495_s8 = scalar_lea.vmem %s399_s7, 16  ;;  %s499_s18 = scalar_lea.vmem %s399_s7, 32 }
  0x15   :  { %476 = vmatpush3.bf16.msra.mxu1 %v230_v14  ;;  %p496_p0 = scmp.ne.s32.totalorder %s399_s7, %s495_s8  ;;  %p500_p1 = scmp.lt.s32.totalorder %s399_s7, %s399_s7 }
  0x16   :  { %463 = vmatprep.subr.bf16.mxu1 %v519_v1  ;;  %p501_p2 = scmp.lt.s32.totalorder %s499_s18, %s495_s8 }
  0x17   :  { %364 = vperm.xlu0 %481, %v360_v21  }
  0x18   :  { %460 = vmatmul.mubr.msk.bf16.vlgmr.msra.gmra.mrb[4].mxu1 %vm218_vm4, %v488_v20  ;;  %305 = vperm.xlu1 %482, %v297_v22   ;;  %p502_p3 = por %p501_p2, %p500_p1 }
  0x19   :  { %467 = vmatprep.mubr.msk.bf16.mxu1 %vm520_vm2, %v519_v1 }
  0x1a   :  { %456 = vmatmul.mubr.msk.bf16.gmra.mrb[8].mxu0 %vm218_vm4, %v489_v23  ;;  %p503_p4 = pnand %p502_p3, %p496_p0 }
  0x1b   :  { %187 = vperm.xlu0 %481, %v164_v24  }
  0x1c   :  { %369 = vperm.xlu1 %482, %v361_v25  }
  0x85   :  { %v168_v34 = vpop.permute.xlu0 %167 }
  0x8e   :  { %v173_v40 = vpop.permute.xlu0 %172 }
  0x8f   :  { %v178_v44 = vpop.permute.xlu1 %177 }
  0x92   :  { %v301_v63 = vpop.permute.xlu0 %300 }
  0x93   :  { %v183_v55 = vpop.permute.xlu1 %182 }
  0x96   :  { %v365_v11 = vpop.permute.xlu0 %364 }
  0x97   :  { %v306_v0 = vpop.permute.xlu1 %305 }
  0x9a   :  { %v188_v24 = vpop.permute.xlu0 %187 }
  0x9b   :  { %v370_v12 = vpop.permute.xlu1 %369 }
  0xd9   :  { %v87_v26 = vpop.f32.mrb[0].mxu0 }
  0xda   :  { %v437_v27 = vpop.f32.mrb[1].mxu0  ;;  %v141_v30 = vmul.f32 %v87_v26, %v87_v26 }
  0xdb   :  { %v655_v28 = vpop.f32.mrb[2].mxu0 }
  0xdc   :  { %v438_v29 = vpop.f32.mrb[3].mxu0 }
  0xdf   :  { %v135_v31 = vpop.f32.mrb[0].mxu1 }
  0xe0   :  { %v142_v32 = vsub.f32 %v141_v30, %v135_v31  ;;  %v443_v33 = vpop.f32.mrb[1].mxu1 }
  0xe1   :  { %v138_v35 = vpop.f32.mrb[2].mxu1 }
  0xe2   :  { %v444_v36 = vpop.f32.mrb[3].mxu1  ;;  %v143_v3 = vrot.slane %v142_v32, 4 }
  0xe4   :  { %v144_v9 = vadd.f32 %v143_v3, %v142_v32 }
  0xe5   :  { %v266_v37 = vpop.f32.mrb[4].mxu0 }
  0xe6   :  { %v267_v38 = vadd.f32 %v266_v37, %v168_v34  ;;  %v453_v39 = vpop.f32.mrb[5].mxu0  ;;  %v145_v15 = vrot.slane %v144_v9, 2 }
  0xe7   :  { %v269_v41 = vpop.f32.mrb[6].mxu0 }
  0xe8   :  { %v270_v42 = vadd.f32 %v269_v41, %v173_v40  ;;  %v454_v43 = vpop.f32.mrb[7].mxu0  ;;  %v288_v45 = vmax.f32 %v267_v38, 0.0  ;;  %v146_v18 = vadd.f32 %v145_v15, %v144_v9 }
  0xea   :  { %v289_v46 = vmax.f32 %v270_v42, 0.0  ;;  %v147_v21 = vrot.slane %v146_v18, 1 }
  0xeb   :  { %v282_v47 = vpop.f32.mrb[4].mxu1 }
  0xec   :  { %v294_v48 = vpack.c.bf16 %v289_v46, %v288_v45  ;;  %v461_v49 = vpop.f32.mrb[5].mxu1  ;;  %v148_v25 = vadd.f32 %v147_v21, %v146_v18  ;;  %v283_v26 = vadd.f32 %v282_v47, %v188_v24 }
  0xed   :  { %v274_v50 = vpop.f32.mrb[8].mxu0  ;;  %v285_v51 = vpop.f32.mrb[6].mxu1 }
  0xee   :  { %v275_v52 = vadd.f32 %v274_v50, %v178_v44  ;;  %v457_v53 = vpop.f32.mrb[9].mxu0  ;;  %464 = vmatpush3.bf16.msra.mxu1 %v294_v48  ;;  %v462_v54 = vpop.f32.mrb[7].mxu1  ;;  %v149_v30 = vmul.f32 0.5, %v148_v25 }
  0xef   :  { %v277_v56 = vpop.f32.mrb[10].mxu0  ;;  %465 = vmatprep.subr.bf16.mxu1 %v519_v1 }
  0xf0   :  { %v278_v57 = vadd.f32 %v277_v56, %v183_v55  ;;  %v458_v58 = vpop.f32.mrb[11].mxu0  ;;  %v290_v59 = vmax.f32 %v275_v52, 0.0 }
  0xf2   :  { %v291_v60 = vmax.f32 %v278_v57, 0.0 }
  0xf4   :  { %v295_v61 = vpack.c.bf16 %v291_v60, %v290_v59 }
  0xf6   :  { %466 = vmatpush3.bf16.msra.mxu1 %v295_v61 }
  0xf9   :  { %468 = vmatmul.mubr.msk.bf16.vlgmr.msra.gmra.mrb[8].mxu1 %vm313_vm5, %v490_v62 }
 0x1cc   :  { %v351_v2 = vpop.f32.mrb[8].mxu1 }
 0x1cd   :  { %v352_v4 = vadd.f32 %v351_v2, %v301_v63  ;;  %v469_v5 = vpop.f32.mrb[9].mxu1 }
 0x1ce   :  { %v354_v6 = vpop.f32.mrb[10].mxu1 }
 0x1cf   :  { %v358_v1 = vmax.f32 %v352_v4, 0.0  ;;  %v355_v7 = vadd.f32 %v354_v6, %v306_v0  ;;  %v470_v8 = vpop.f32.mrb[11].mxu1 }
 0x1d1   :  { %v359_v10 = vmax.f32 %v355_v7, 0.0  ;;  %v372_v13 = vmul.f32 %v365_v11, %v358_v1 }
 0x1d3   :  { %v373_v14 = vmul.f32 %v370_v12, %v359_v10 }
 0x1d5   :  { %v374_v16 = vadd.f32 %v373_v14, %v372_v13 }
 0x1d7   :  { %v375_v17 = vrot.slane %v374_v16, 4 }
 0x1d9   :  { %v376_v19 = vadd.f32 %v375_v17, %v374_v16 }
 0x1db   :  { %v377_v20 = vrot.slane %v376_v19, 2 }
 0x1dd   :  { %v378_v22 = vadd.f32 %v377_v20, %v376_v19 }
 0x1df   :  { %v379_v23 = vrot.slane %v378_v22, 1 }
 0x1e1   :  { %v380_v27 = vadd.f32 %v379_v23, %v378_v22 }
 0x1e3   :  { %v381_v29 = vadd.f32 %v380_v27, %v283_v26 }
 0x1e5   :  { %v382_v31 = vadd.f32 %v381_v29, %v655_v28 }
 0x1e7   :  { %v383_v32 = vadd.f32 %v382_v31, %v149_v30 }
 0x1e9   :  { %v384_v33 = vmul.f32 0.5, %v383_v32 }
 0x1eb   :  { %v385_v34 = vsub.f32 0.0, %v384_v33 }
 0x1ed   :  { %v386_v35 = vmul.f32 1.442695, %v385_v34 }
 0x1ef   :  { %491 = vpow2.f32 %v386_v35 }
 0x1f9   :  { %v492_v36 = vpop.eup %491 }
 0x1fa   :  { %v388_v37 = vadd.f32 1.0, %v492_v36 }
 0x1fc   :  { %493 = vrcp.f32 %v388_v37 }
 0x206   :  { %v494_v38 = vpop.eup %493 }
 0x207   :  { %391 = vst [vmem:[#allocation2] sm:$0x1] %v494_v38 }
 0x208   :  { %506 = shalt.err (!%p503_p4)
}
 0x209   :  { %s507_s1 = scalar_lea.hbm %s683_s9, 16 }
 0x20a   :  { %p508_p5 = scmp.ne.s32.totalorder %s683_s9, %s507_s1  ;;  %p511_p6 = scmp.lt.u32.totalorder %s507_s1, %s683_s9 }
 0x20c   :  { %p513_p7 = pnand %p511_p6, %p508_p5 }
 0x20e   :  { %516 = shalt.err (!%p513_p7)
}
 0x20f   :  { %401 = dma.vmem_to_hbm [thread:$0]  %s399_s7, 16, %s683_s9, [#allocation3]  }
 0x210   :  { %517 = dma.done.wait [#allocation3], 16  }
 0x211   :  { %518 = vsyncadd [#allocation3], 4294967280 }
 0x212   :  { %405 = vsyncpa [#allocation3], 1 }

</bundles_post_ra>
